<compile_context>
chip_gen: v5e
topology: v5e:2x2
jax: 0.10.0
libtpu: 0.0.40
codegen_flags: <defaults>
</compile_context>

<pallas_src>
import jax
import jax.numpy as jnp
from jax.experimental import pallas as pl
from jax.experimental.pallas import tpu as pltpu


def _scalarmix_kernel(w_ref, *refs):
    """w_ref: [N] f32 in SMEM (softmax(w) * gamma); refs = (*in_refs, out_ref)."""
    *in_refs, o_ref = refs
    acc = None
    for k, r in enumerate(in_refs):
        x = r[...]
        if x.dtype != jnp.float32:
            x = x.astype(jnp.float32)
        term = w_ref[k] * x
        acc = term if acc is None else acc + term
    o_ref[...] = acc.astype(o_ref.dtype)


def _pick_row_tile(M, H, n_layers, itemsize, sublane, target):
    """Largest row tile <= target that divides M, respects sublane packing and a
    v7x-safe double-buffered VMEM budget, and prefers a grid of >= 2 tiles."""
    vmem_budget = 40 * 1024 * 1024  # leave headroom under v7x's 64 MiB VMEM
    # double-buffered: N inputs + 1 output per step
    max_tm = max(sublane, vmem_budget // (2 * (n_layers + 1) * H * itemsize))
    tm = min(target, M, max_tm)
    tm = max(sublane, (tm // sublane) * sublane)
    while M % tm:
        tm -= sublane
    # keep at least 2 row tiles so the parallel axis can shard across v7x's 2 TCs
    if M // tm < 2:
        half = tm // 2
        if half >= sublane and half % sublane == 0 and M % half == 0:
            tm = half
    return tm


def scalar_mix(tensors, weights, gamma, *, tm=512):
    """tensors: list of N arrays [B, S, H]; weights: [N]; gamma: [1]."""
    n_layers = len(tensors)
    B, S, H = tensors[0].shape
    M = B * S
    dtype = tensors[0].dtype
    itemsize = jnp.dtype(dtype).itemsize
    sublane = {4: 8, 2: 16, 1: 32}[itemsize]  # sub-32-bit dtypes pack along sublanes

    assert H % 128 == 0, "hidden size must be a multiple of 128 (lane axis)"
    assert M % sublane == 0, "batch*seq must be sublane-aligned for this dtype"

    tm = _pick_row_tile(M, H, n_layers, itemsize, sublane, tm)
    grid = (M // tm,)

    # Tiny scalar math stays in plain JAX; fold gamma into the softmax weights.
    sw = (jax.nn.softmax(weights.astype(jnp.float32), axis=-1)
          * gamma.astype(jnp.float32)[0])

    # Flatten (B, S, H) -> (M, H); pure metadata reshape, no HBM copy.
    flat = [t.reshape(M, H) for t in tensors]

    bytes_accessed = (n_layers + 1) * M * H * itemsize
    cost = pl.CostEstimate(flops=2 * n_layers * M * H,
                           transcendentals=0,
                           bytes_accessed=bytes_accessed)

    out = pl.pallas_call(
        _scalarmix_kernel,
        out_shape=jax.ShapeDtypeStruct((M, H), dtype),
        grid_spec=pltpu.PrefetchScalarGridSpec(
            num_scalar_prefetch=1,  # folded softmax(w)*gamma -> SMEM
            grid=grid,
            in_specs=[pl.BlockSpec((tm, H), lambda i, w: (i, 0))
                      for _ in range(n_layers)],
            out_specs=pl.BlockSpec((tm, H), lambda i, w: (i, 0)),
        ),
        compiler_params=pltpu.CompilerParams(
            dimension_semantics=("parallel",),
            vmem_limit_bytes=48 * 1024 * 1024,  # < v7x 64 MiB physical, > 32 MiB default
        ),
        cost_estimate=cost,
    )(sw, *flat)

    return out.reshape(B, S, H)


def scalar_mix_ref(tensors, weights, gamma):
    s = jax.nn.softmax(weights.astype(jnp.float32), axis=-1)
    acc = sum(w * t.astype(jnp.float32) for w, t in zip(s, tensors))
    return (gamma[0] * acc).astype(tensors[0].dtype)


if __name__ == "__main__":
    key = jax.random.PRNGKey(0)
    n_layers, B, S, H = 4, 2, 8, 128

    # Deterministic non-trivial parameters (module init is weights=0, gamma=1).
    weights = jnp.arange(n_layers, dtype=jnp.float32) * 0.1
    gamma = jnp.array([1.25], dtype=jnp.float32)

    keys = jax.random.split(key, n_layers)
    tensors = [jax.random.normal(k, (B, S, H), dtype=jnp.float32) for k in keys]

    out = scalar_mix(tensors, weights, gamma)
    out = jax.block_until_ready(out)

    ref = scalar_mix_ref(tensors, weights, gamma)
    assert out.shape == (B, S, H)
    assert jnp.allclose(out, ref, atol=1e-5, rtol=1e-5), "mismatch vs reference"

    print("KERNEL_OK")
</pallas_src>

<mosaic_0001>
module attributes {stable_mosaic.version = 11 : i64} {
  func.func @_scalarmix_kernel(%arg0: i32, %arg1: memref<4xf32, #tpu.memory_space<smem>>, %arg2: memref<8x128xf32, #tpu.memory_space<vmem>>, %arg3: memref<8x128xf32, #tpu.memory_space<vmem>>, %arg4: memref<8x128xf32, #tpu.memory_space<vmem>>, %arg5: memref<8x128xf32, #tpu.memory_space<vmem>>, %arg6: memref<8x128xf32, #tpu.memory_space<vmem>>) attributes {dimension_semantics = [#tpu.dimension_semantics<parallel>], iteration_bounds = array<i64: 2>, scalar_prefetch = 1 : i64, scratch_operands = 0 : i64, tpu.core_type = #tpu.core_type<tc>, window_params = [{transform_indices = @transform_0, window_bounds = array<i64: 8, 128>}, {transform_indices = @transform_1, window_bounds = array<i64: 8, 128>}, {transform_indices = @transform_2, window_bounds = array<i64: 8, 128>}, {transform_indices = @transform_3, window_bounds = array<i64: 8, 128>}, {transform_indices = @transform_4, window_bounds = array<i64: 8, 128>}]} {
    %c0 = arith.constant 0 : index
    %c0_0 = arith.constant 0 : index
    %0 = vector.load %arg2[%c0, %c0_0] : memref<8x128xf32, #tpu.memory_space<vmem>>, vector<8x128xf32>
    %c0_1 = arith.constant 0 : index
    %1 = memref.load %arg1[%c0_1] : memref<4xf32, #tpu.memory_space<smem>>
    %2 = vector.broadcast %1 : f32 to vector<8x128xf32>
    %3 = arith.mulf %2, %0 : vector<8x128xf32>
    %c0_2 = arith.constant 0 : index
    %c0_3 = arith.constant 0 : index
    %4 = vector.load %arg3[%c0_2, %c0_3] : memref<8x128xf32, #tpu.memory_space<vmem>>, vector<8x128xf32>
    %c1 = arith.constant 1 : index
    %5 = memref.load %arg1[%c1] : memref<4xf32, #tpu.memory_space<smem>>
    %6 = vector.broadcast %5 : f32 to vector<8x128xf32>
    %7 = arith.mulf %6, %4 : vector<8x128xf32>
    %8 = arith.addf %3, %7 : vector<8x128xf32>
    %c0_4 = arith.constant 0 : index
    %c0_5 = arith.constant 0 : index
    %9 = vector.load %arg4[%c0_4, %c0_5] : memref<8x128xf32, #tpu.memory_space<vmem>>, vector<8x128xf32>
    %c2 = arith.constant 2 : index
    %10 = memref.load %arg1[%c2] : memref<4xf32, #tpu.memory_space<smem>>
    %11 = vector.broadcast %10 : f32 to vector<8x128xf32>
    %12 = arith.mulf %11, %9 : vector<8x128xf32>
    %13 = arith.addf %8, %12 : vector<8x128xf32>
    %c0_6 = arith.constant 0 : index
    %c0_7 = arith.constant 0 : index
    %14 = vector.load %arg5[%c0_6, %c0_7] : memref<8x128xf32, #tpu.memory_space<vmem>>, vector<8x128xf32>
    %c3 = arith.constant 3 : index
    %15 = memref.load %arg1[%c3] : memref<4xf32, #tpu.memory_space<smem>>
    %16 = vector.broadcast %15 : f32 to vector<8x128xf32>
    %17 = arith.mulf %16, %14 : vector<8x128xf32>
    %18 = arith.addf %13, %17 : vector<8x128xf32>
    %c0_8 = arith.constant 0 : index
    %c0_9 = arith.constant 0 : index
    %19 = vector.load %arg6[%c0_8, %c0_9] : memref<8x128xf32, #tpu.memory_space<vmem>>, vector<8x128xf32>
    tpu.vector_store %arg6[%c0_8, %c0_9], %18 {strides = array<i32>} : memref<8x128xf32, #tpu.memory_space<vmem>>, vector<8x128xf32>,
    return
  }
  func.func @transform_0(%arg0: i32, %arg1: memref<4xf32, #tpu.memory_space<smem>>) -> (i32, i32) {
    %c0_i32 = arith.constant 0 : i32
    %c0_i32_0 = arith.constant 0 : i32
    return %arg0, %c0_i32 : i32, i32
  }
  func.func @transform_1(%arg0: i32, %arg1: memref<4xf32, #tpu.memory_space<smem>>) -> (i32, i32) {
    %c0_i32 = arith.constant 0 : i32
    %c0_i32_0 = arith.constant 0 : i32
    return %arg0, %c0_i32 : i32, i32
  }
  func.func @transform_2(%arg0: i32, %arg1: memref<4xf32, #tpu.memory_space<smem>>) -> (i32, i32) {
    %c0_i32 = arith.constant 0 : i32
    %c0_i32_0 = arith.constant 0 : i32
    return %arg0, %c0_i32 : i32, i32
  }
  func.func @transform_3(%arg0: i32, %arg1: memref<4xf32, #tpu.memory_space<smem>>) -> (i32, i32) {
    %c0_i32 = arith.constant 0 : i32
    %c0_i32_0 = arith.constant 0 : i32
    return %arg0, %c0_i32 : i32, i32
  }
  func.func @transform_4(%arg0: i32, %arg1: memref<4xf32, #tpu.memory_space<smem>>) -> (i32, i32) {
    %c0_i32 = arith.constant 0 : i32
    %c0_i32_0 = arith.constant 0 : i32
    return %arg0, %c0_i32 : i32, i32
  }
}

</mosaic_0001>

<bundles_post_ra>
// kernel: tpu_custom_call.1
= control target key start
LH: loop header
LB: loop body
LE: loop exit
PB: predicated region body
PF: predicated region fallthrough
CT: control target
= control target key end

     0   :  { %s806_s21 = smov [#allocation3]   ;;  %s1049_s0 = inlined_call_operand.hbm [shape: f32[4], index: 0, kind: input, shape index: {}]   ;;  %s1050_s1 = inlined_call_operand.hbm [shape: f32[16,128], index: 1, kind: input, shape index: {}]   ;;  %s1051_s2 = inlined_call_operand.hbm [shape: f32[16,128], index: 2, kind: input, shape index: {}]   ;;  %s1052_s3 = inlined_call_operand.hbm [shape: f32[16,128], index: 3, kind: input, shape index: {}]   ;;  %s1053_s4 = inlined_call_operand.hbm [shape: f32[16,128], index: 4, kind: input, shape index: {}]   ;;  %s1054_s5 = inlined_call_operand.hbm [shape: f32[16,128], index: 5, kind: output, shape index: {}]  }
   0x1   :  { %1058 = sst [smem:[#allocation21_spill]] %s1051_s2  ;;  %s11_s20 = sshll.u32 %s1049_s0, 4  ;;  %s12_s20 = int_to_ptr.hbm [resolvable:$true] %s11_s20 }
   0x2   :  { %14 = dma.hbm_to_smem %s12_s20, 16, %s806_s21, [#allocation2] }
   0x3   :  { %772 = dma.done.wait [#allocation2], 16 }
   0x4   :  { %773 = vsyncadd [#allocation2], 4294967280 }
   0x5   :  { %17 = sfence }
   0x6   :  { %18 = vsyncpa [#allocation5], 0 }
   0x7   :  { %20 = vsyncpa [#allocation5 + $0x1], 0 }
   0x8   :  { %21 = vsyncpa [#allocation8], 0 }
   0x9   :  { %23 = vsyncpa [#allocation8 + $0x1], 0 }
   0xa   :  { %24 = vsyncpa [#allocation11], 0 }
   0xb   :  { %26 = vsyncpa [#allocation11 + $0x1], 0 }
   0xc   :  { %27 = vsyncpa [#allocation6], 0 }
   0xd   :  { %29 = vsyncpa [#allocation6 + $0x1], 0  ;;  %s840_s22 = smov 0   ;;  %s842_s23 = smov 0  }
   0xe   :  { %s844_s24 = smov 0   ;;  %s846_s0 = smov 0  }
   0xf LB: > { %1059 = sst [smem:[#allocation18_spill]] %s800_s24  ;;  %s861_s25 = sadd.s32 4294967295, %s804_s0   ;;  %s804_s0 = sphi %s846_s0, %s1068_s0   ;;  %s800_s24 = sphi %s844_s24, %s1070_s24   ;;  %s796_s23 = sphi %s842_s23, %s1072_s23   ;;  %s792_s22 = sphi %s840_s22, %s1071_s22  }
  0x10   : > { %s510_s26 = sadd.s32 4294967294, %s804_s0   ;;  %s865_s27 = sadd.s32 1, %s804_s0  }
  0x11   : > { %1060 = sst [smem:[#allocation19_spill]] %s865_s27  ;;  %s42_s28 = sadd.s32 1, %s800_s24 }
  0x12   : > { %s39_s29 = ssub.s32 %s804_s0, %s865_s27  ;;  %p49_p0 = scmp.ne.s32.totalorder %s800_s24, %s796_s23 }
  0x13   : > { %p40_p1 = scmp.eq.s32.totalorder %s39_s29, 0  ;;  %p50_p2 = scmp.eq.s32.totalorder %s804_s0, 0 }
  0x14   : > { %p55_p3 = scmp.ne.s32.totalorder %s796_s23, %s792_s22  ;;  %p56_p4 = scmp.eq.s32.totalorder %s861_s25, 0 }
  0x15   : > { %s877_s30 = scalar_select %p40_p1, %s800_s24, %s42_s28  }
  0x16   : > { %p51_p5 = por %p50_p2, %p49_p0  ;;  %p879_p6 = por %p56_p4, %p55_p3 }
  0x17   : > { %1061 = sst [smem:[#allocation20_spill]] %s877_s30  ;;  %p157_p7 = scmp.eq.s32.totalorder %s861_s25, 1 }
  0x18   : > { %p163_p8 = scmp.eq.s32.totalorder %s510_s26, 1  ;;  %p512_p9 = scmp.ge.s32.totalorder %s804_s0, 2 }
  0x19   : > { %p561_p10 = scmp.lt.s32.totalorder %s804_s0, 2  ;;  %p886_p11 = por %p157_p7, %p49_p0 }
  0x1a   : > { %p890_p12 = por %p163_p8, %p55_p3  ;;  %s895_s9 = sand.u32 1, %s800_s24  }
  0x1b   : > { %s898_s10 = sshll.u32 %s804_s0, 3  ;;  %s901_s11 = sshll.u32 %s895_s9, 3 }
  0x1c   : > { %p903_p13 = pnand %p561_p10, %p51_p5  ;;  %s202_s13 = sand.u32 1, %s804_s0  }
  0x1d   : > { %s1066_s2 = sld [smem:[#allocation21_spill]]  ;;  %s206_s17 = scalar_lea.vmem [#allocation7], %s901_s11 }
  0x1e   : > { %s214_s18 = sshll.u32 %s206_s17, 4  ;;  %p521_p0 = scmp.ge.s32.totalorder %s804_s0, 1  ;;  %s215_s18 = int_to_ptr.vmem [resolvable:$true] %s214_s18 }
  0x1f   : > { %s914_s20 = scalar_lea.sflag [#allocation8], %s202_s13  ;;  %p612_p2 = pneg %p903_p13 }
  0x23   : > { %s210_s16 = scalar_lea.hbm %s1066_s2, %s898_s10  ;;  %s615_s14 = scalar_lea.hbm %s1066_s2, 16 }
  0x24   : > { %s212_s19 = sshll.u32 %s210_s16, 4  ;;  %s213_s19 = int_to_ptr.hbm [resolvable:$true] %s212_s19 }
  0x25   : > { %s608_s21 = sshra.s32 %s213_s19, 4  ;;  %s609_s21 = int_to_ptr.hbm [resolvable:$true] %s608_s21 }
  0x26   : > { %s610_s26 = scalar_lea.hbm %s609_s21, 8  ;;  %p616_p5 = scmp.lt.s32.totalorder %s609_s21, %s1066_s2 }
  0x27   : > { %p611_p1 = scmp.ne.s32.totalorder %s609_s21, %s610_s26  ;;  %p617_p7 = scmp.lt.s32.totalorder %s615_s14, %s610_s26 }
  0x29   : > { %p613_p3 = pnand %p612_p2, %p611_p1  ;;  %p618_p8 = por %p617_p7, %p616_p5 }
  0x2b   : > { %p614_p4 = pneg %p613_p3 }
  0x2d   : > { %p619_p10 = pnand %p618_p8, %p614_p4 }
  0x2f   : > { %622 = shalt.err (!%p619_p10)
}
  0x30   : > { %550 = dma.hbm_to_vmem [thread:$0]  (!%p903_p13), %s213_s19, 128, %s215_s18, %s914_s20  }
  0x31   : > { %p257_p1 = scmp.lt.s32.totalorder %s804_s0, 3  ;;  %s191_s28 = scalar_lea.hbm %s1050_s1, %s898_s10 }
  0x32   : > { %s193_s26 = sshll.u32 %s191_s28, 4  ;;  %s187_s29 = scalar_lea.vmem [#allocation4], %s901_s11  ;;  %s194_s26 = int_to_ptr.hbm [resolvable:$true] %s193_s26 }
  0x33   : > { %p937_p3 = pnand %p521_p0, %p257_p1  ;;  %s195_s14 = sshll.u32 %s187_s29, 4  ;;  %s196_s14 = int_to_ptr.vmem [resolvable:$true] %s195_s14 }
  0x34   : > { %s184_s15 = scalar_lea.sflag [#allocation5], %s895_s9  ;;  %s638_s16 = sshra.s32 %s194_s26, 4  ;;  %s639_s16 = int_to_ptr.hbm [resolvable:$true] %s638_s16 }
  0x35   : > { %s640_s2 = scalar_lea.hbm %s639_s16, 8  ;;  %s645_s13 = scalar_lea.hbm %s1050_s1, 16 }
  0x36   : > { %p641_p4 = scmp.ne.s32.totalorder %s639_s16, %s640_s2  ;;  %p646_p0 = scmp.lt.s32.totalorder %s639_s16, %s1050_s1 }
  0x37   : > { %p647_p8 = scmp.lt.s32.totalorder %s645_s13, %s640_s2 }
  0x38   : > { %p643_p5 = pnand %p641_p4, %p612_p2 }
  0x39   : > { %p648_p10 = por %p647_p8, %p646_p0 }
  0x3a   : > { %p644_p7 = pneg %p643_p5 }
  0x3c   : > { %p649_p1 = pnand %p648_p10, %p644_p7 }
  0x3e   : > { %652 = shalt.err (!%p649_p1)
}
  0x3f   : > { %547 = dma.hbm_to_vmem [thread:$0]  (!%p903_p13), %s194_s26, 128, %s196_s14, %s184_s15  }
  0x40   : > { %s229_s24 = scalar_lea.hbm %s1052_s3, %s898_s10  ;;  %s225_s18 = scalar_lea.vmem [#allocation9], %s901_s11 }
  0x41   : > { %s233_s19 = sshll.u32 %s225_s18, 4  ;;  %s231_s27 = sshll.u32 %s229_s24, 4  ;;  %s234_s19 = int_to_ptr.vmem [resolvable:$true] %s233_s19  ;;  %s232_s27 = int_to_ptr.hbm [resolvable:$true] %s231_s27 }
  0x42   : > { %s668_s30 = sshra.s32 %s232_s27, 4  ;;  %s675_s26 = scalar_lea.hbm %s1052_s3, 16  ;;  %s669_s30 = int_to_ptr.hbm [resolvable:$true] %s668_s30 }
  0x43   : > { %s670_s2 = scalar_lea.hbm %s669_s30, 8  ;;  %p676_p0 = scmp.lt.s32.totalorder %s669_s30, %s1052_s3 }
  0x44   : > { %p671_p4 = scmp.ne.s32.totalorder %s669_s30, %s670_s2  ;;  %p677_p8 = scmp.lt.s32.totalorder %s675_s26, %s670_s2 }
  0x46   : > { %p673_p5 = pnand %p671_p4, %p612_p2  ;;  %p678_p10 = por %p677_p8, %p676_p0 }
  0x48   : > { %p674_p7 = pneg %p673_p5 }
  0x4a   : > { %p679_p1 = pnand %p678_p10, %p674_p7 }
  0x4c   : > { %682 = shalt.err (!%p679_p1)
}
  0x4d   : > { %553 = dma.hbm_to_vmem [thread:$0]  (!%p903_p13), %s232_s27, 128, %s234_s19, %s914_s20  }
  0x4e   : > { %s248_s28 = scalar_lea.hbm %s1053_s4, %s898_s10  ;;  %s244_s18 = scalar_lea.vmem [#allocation10], %s901_s11 }
  0x4f   : > { %s250_s29 = sshll.u32 %s248_s28, 4  ;;  %s252_s16 = sshll.u32 %s244_s18, 4  ;;  %s251_s29 = int_to_ptr.hbm [resolvable:$true] %s250_s29  ;;  %s253_s16 = int_to_ptr.vmem [resolvable:$true] %s252_s16 }
  0x50   : > { %s241_s30 = scalar_lea.sflag [#allocation11], %s895_s9  ;;  %s698_s2 = sshra.s32 %s251_s29, 4  ;;  %s699_s2 = int_to_ptr.hbm [resolvable:$true] %s698_s2 }
  0x51   : > { %s700_s13 = scalar_lea.hbm %s699_s2, 8  ;;  %s705_s20 = scalar_lea.hbm %s1053_s4, 16 }
  0x52   : > { %p701_p4 = scmp.ne.s32.totalorder %s699_s2, %s700_s13  ;;  %p706_p0 = scmp.lt.s32.totalorder %s699_s2, %s1053_s4 }
  0x53   : > { %p707_p8 = scmp.lt.s32.totalorder %s705_s20, %s700_s13 }
  0x54   : > { %p703_p5 = pnand %p701_p4, %p612_p2 }
  0x55   : > { %p708_p10 = por %p707_p8, %p706_p0 }
  0x56   : > { %p704_p7 = pneg %p703_p5 }
  0x58   : > { %p709_p1 = pnand %p708_p10, %p704_p7 }
  0x5a   : > { %712 = shalt.err (!%p709_p1)
}
  0x5b   : > { %556 = dma.hbm_to_vmem [thread:$0]  (!%p903_p13), %s251_s29, 128, %s253_s16, %s241_s30  }
  0x5c   : > { %261 = sbr.rel (%p937_p3) target bundleno = 123 (0x7b), region = 36  ;;  %s991_s9 = sand.u32 (!%p937_p3), 1, %s796_s23  }
  0x5d   : > { %s994_s11 = sshll.u32 (!%p937_p3), %s991_s9, 3  ;;  %s264_s14 = scalar_lea.sflag (!%p937_p3), [#allocation5], %s991_s9 }
  0x5e   : > { %s267_s15 = scalar_lea.vmem (!%p937_p3), [#allocation4], %s994_s11 }
  0x61   : > { %775 = dma.done.wait (%p879_p6), %s264_s14, 128  }
  0x62   : > { %777 = vsyncadd (%p879_p6), %s264_s14, 4294967168  ;;  %s273_s12 = sand.u32 1, %s861_s25   ;;  %s277_s24 = scalar_lea.vmem [#allocation7], %s994_s11 }
  0x63   : > { %s274_s21 = scalar_lea.sflag [#allocation8], %s273_s12 }
  0x64   : > { %779 = dma.done.wait (%p879_p6), %s274_s21, 256  }
  0x65   : > { %781 = vsyncadd (%p879_p6), %s274_s21, 4294967040  ;;  %s287_s17 = scalar_lea.vmem [#allocation9], %s994_s11  ;;  %s294_s28 = scalar_lea.sflag [#allocation11], %s991_s9 }
  0x66   : > { %s297_s29 = scalar_lea.vmem [#allocation10], %s994_s11 }
  0x67   : > { %783 = dma.done.wait (%p879_p6), %s294_s28, 128  }
  0x68   : > { %785 = vsyncadd (%p879_p6), %s294_s28, 4294967168  ;;  %s339_s18 = sld [smem:[#allocation3]]  ;;  %s531_s13 = sshll.u32 %s861_s25, 3  ;;  %v338_v0 = vld [vmem:[%s267_s15] sm:$0xff]  ;;  %v342_v2 = vld [vmem:[%s277_s24] sm:$0xff] }
  0x69   : > { %s527_s16 = sld [smem:[#allocation3 + $0x1]]  ;;  %v347_v3 = vld [vmem:[%s287_s17] sm:$0xff]  ;;  %v352_v6 = vld [vmem:[%s297_s29] sm:$0xff]  ;;  %s369_s27 = scalar_lea.hbm %s1054_s5, %s531_s13 }
  0x6a   : > { %s528_s30 = sld [smem:[#allocation3 + $0x2]]  ;;  %s337_s25 = scalar_lea.vmem [#allocation12], %s994_s11 }
  0x6b   : > { %s529_s2 = sld [smem:[#allocation3 + $0x3]]  ;;  %s371_s20 = sshll.u32 %s337_s25, 4  ;;  %s372_s20 = int_to_ptr.vmem [resolvable:$true] %s371_s20 }
  0x6c   : > { %s373_s19 = sshll.u32 %s369_s27, 4  ;;  %s359_s10 = scalar_lea.sflag [#allocation6], %s991_s9  ;;  %s374_s19 = int_to_ptr.hbm [resolvable:$true] %s373_s19 }
  0x6d   : > { %s742_s14 = sshra.s32 %s374_s19, 4  ;;  %s748_s24 = scalar_lea.hbm %s1054_s5, 16  ;;  %s743_s14 = int_to_ptr.hbm [resolvable:$true] %s742_s14 }
  0x6e   : > { %v340_v1 = vstv %s339_s18  ;;  %s744_s15 = scalar_lea.hbm %s743_s14, 8  ;;  %p749_p3 = scmp.lt.s32.totalorder %s743_s14, %s1054_s5 }
  0x6f   : > { %v341_v4 = vmul.f32 %v340_v1, %v338_v0  ;;  %v344_v5 = vstv %s527_s16  ;;  %p745_p6 = scmp.ne.s32.totalorder %s743_s14, %s744_s15  ;;  %p750_p4 = scmp.lt.s32.totalorder %s748_s24, %s744_s15 }
  0x70   : > { %v345_v7 = vmul.f32 %v344_v5, %v342_v2  ;;  %v349_v8 = vstv %s528_s30 }
  0x71   : > { %v350_v9 = vmul.f32 %v349_v8, %v347_v3  ;;  %v354_v10 = vstv %s529_s2  ;;  %p746_p13 = pnand %p745_p6, %p886_p11  ;;  %p751_p5 = por %p750_p4, %p749_p3 }
  0x72   : > { %v346_v11 = vadd.f32 %v345_v7, %v341_v4  ;;  %v355_v12 = vmul.f32 %v354_v10, %v352_v6 }
  0x73   : > { %p747_p2 = pneg %p746_p13 }
  0x74   : > { %v351_v13 = vadd.f32 %v350_v9, %v346_v11 }
  0x75   : > { %p752_p7 = pnand %p751_p5, %p747_p2 }
  0x76   : > { %v356_v14 = vadd.f32 %v355_v12, %v351_v13 }
  0x78   : > { %357 = vst [vmem:[%s337_s25] sm:$0xff] %v356_v14 }
  0x79   : > { %755 = shalt.err (!%p752_p7)
}
  0x7a   : > { %542 = dma.vmem_to_hbm [thread:$0]  (%p886_p11), %s372_s20, 128, %s374_s19, %s359_s10  }
  0x7b PF: > { %s385_s9 = sand.u32 1, %s792_s22   ;;  %p558_p0 = pnand %p512_p9, %p890_p12 }
  0x7c   : > { %s386_s28 = scalar_lea.sflag [#allocation6], %s385_s9 }
  0x7d   : > { %p559_p8 = pneg %p558_p0 }
  0x7f   : > { %787 = dma.done.wait (%p559_p8), %s386_s28, 128  }
  0x80   : > { %789 = vsyncadd (%p559_p8), %s386_s28, 4294967168  ;;  %s1068_s0 = sld [smem:[#allocation19_spill]]  ;;  %s1071_s22 = smov %s796_s23 }
  0x81   : > { %s1069_s29 = sld [smem:[#allocation18_spill]] }
  0x82   : > { %s1070_s24 = sld [smem:[#allocation20_spill]] }
  0x86   : > { %p32_p10 = scmp.ge.s32.totalorder %s1068_s0, 4  }
  0x87   : > { %s1072_s23 = smov %s1069_s29 }
  0x88   :  { %34 = sbr.rel (!%p32_p10) target bundleno = 15 (0xf), region = 118 }
  0x8d   :  { %392 = vsyncpa [#allocation5], 1 }
  0x8e   :  { %394 = vsyncpa [#allocation5 + $0x1], 1 }
  0x8f   :  { %395 = vsyncpa [#allocation8], 1 }
  0x90   :  { %397 = vsyncpa [#allocation8 + $0x1], 1 }
  0x91   :  { %398 = vsyncpa [#allocation11], 1 }
  0x92   :  { %400 = vsyncpa [#allocation11 + $0x1], 1 }
  0x93   :  { %401 = vsyncpa [#allocation6], 1 }
  0x94   :  { %403 = vsyncpa [#allocation6 + $0x1], 1 }

</bundles_post_ra>
